<compile_context>
chip_gen: v6e
topology: v6e:2x2x1
jax: 0.10.0
libtpu: 0.0.40
codegen_flags: <defaults>
</compile_context>

<pallas_src>
import jax
import jax.numpy as jnp
from jax.experimental import pallas as pl
from jax.experimental.pallas import tpu as pltpu

# ---- problem sizes (small, consistent with the module's forward) ----------
B = 2          # batch
N = 8          # sequence length
DIM = 32       # embedding dim
HEADS = 4      # heads
DIM_HEAD = 16  # per-head dim
INNER = HEADS * DIM_HEAD          # 64
SCALE = DIM_HEAD ** (-0.5)
LN_EPS = 1e-5                     # nn.LayerNorm default


def attention_kernel(x_ref, gamma_ref, beta_ref, wqkv_ref, wout_ref,
                     out_ref, attn_ref):
    """Whole batch in one invocation.

    x_ref    : (B*N, DIM)         VMEM
    gamma_ref: (1, DIM)           VMEM
    beta_ref : (1, DIM)           VMEM
    wqkv_ref : (DIM, 3*INNER)     VMEM  (Q columns pre-scaled by SCALE at init)
    wout_ref : (INNER, DIM)       VMEM
    out_ref  : (B*N, DIM)         VMEM
    attn_ref : (B*N, HEADS*N)     VMEM  (packed; unpacked in the wrapper)
    """
    x = x_ref[...]                                            # (B*N, DIM) f32

    # ---- LayerNorm over last dim (whole batch slab at once) ----------------
    mean = jnp.mean(x, axis=-1, keepdims=True)
    var = jnp.mean(jnp.square(x - mean), axis=-1, keepdims=True)
    xn = (x - mean) * jax.lax.rsqrt(var + LN_EPS)
    xn = xn * gamma_ref[...] + beta_ref[...]                  # broadcast (1, DIM)

    # ---- one QKV projection for the whole batch (SCALE folded into Q cols) --
    qkv = jnp.dot(xn, wqkv_ref[...],
                  preferred_element_type=jnp.float32)         # (B*N, 3*INNER)

    w_out = wout_ref[...]

    # ---- scores for every (batch, head), stacked along sublanes -------------
    dots_list = []
    for b in range(B):
        for h in range(HEADS):
            q = qkv[b * N:(b + 1) * N, h * DIM_HEAD:(h + 1) * DIM_HEAD]
            k = qkv[b * N:(b + 1) * N,
                    INNER + h * DIM_HEAD: INNER + (h + 1) * DIM_HEAD]
            dots_list.append(jnp.dot(q, k.T,
                                     preferred_element_type=jnp.float32))   # (N, N)
    dots = jnp.concatenate(dots_list, axis=0)                 # (B*HEADS*N, N)

    # ---- ONE numerically-stable softmax for all heads and batches -----------
    m = jnp.max(dots, axis=-1, keepdims=True)
    e = jnp.exp(dots - m)
    s = jnp.sum(e, axis=-1, keepdims=True)
    attn = e * pl.reciprocal(s, approx=True)                  # EUP reciprocal

    # ---- per-batch output: sum_h attn_bh @ v_bh @ w_out_h --------------------
    # (no lane-axis concatenate, no (N, INNER) intermediate tile)
    for b in range(B):
        out_b = jnp.zeros((N, DIM), jnp.float32)
        for h in range(HEADS):
            idx = b * HEADS + h
            a = attn[idx * N:(idx + 1) * N, :]                # (N, N)
            # packed attention output, static lane offsets
            attn_ref[b * N:(b + 1) * N, h * N:(h + 1) * N] = a
            v = qkv[b * N:(b + 1) * N,
                    2 * INNER + h * DIM_HEAD: 2 * INNER + (h + 1) * DIM_HEAD]
            ov = jnp.dot(a, v, preferred_element_type=jnp.float32)           # (N, dh)
            out_b = out_b + jnp.dot(ov, w_out[h * DIM_HEAD:(h + 1) * DIM_HEAD, :],
                                    preferred_element_type=jnp.float32)      # (N, DIM)
        out_ref[b * N:(b + 1) * N, :] = out_b.astype(out_ref.dtype)


def fold_scale_into_q(w_qkv):
    """Fold the attention scale into the Q projection columns.

    Call ONCE at weight-construction time (not per forward call)."""
    return jnp.concatenate([w_qkv[:, :INNER] * SCALE, w_qkv[:, INNER:]], axis=1)


def attention_simple(x, gamma, beta, w_qkv_scaled, w_out):
    """x: (B, N, DIM) f32, w_qkv_scaled = fold_scale_into_q(w_qkv).

    Returns (out (B,N,DIM), attn (B,HEADS,N,N))."""
    x2d = x.reshape(B * N, DIM)            # wrapper-side layout plumbing (free)
    gamma2 = gamma.reshape(1, DIM)
    beta2 = beta.reshape(1, DIM)

    out_shapes = (
        jax.ShapeDtypeStruct((B * N, DIM), jnp.float32),
        jax.ShapeDtypeStruct((B * N, HEADS * N), jnp.float32),
    )

    grid_spec = pltpu.PrefetchScalarGridSpec(
        num_scalar_prefetch=0,
        grid=(1,),                                              # single step: no per-batch overhead
        in_specs=[
            pl.BlockSpec((B * N, DIM), lambda i: (0, 0)),        # x (flattened)
            pl.BlockSpec((1, DIM), lambda i: (0, 0)),            # gamma
            pl.BlockSpec((1, DIM), lambda i: (0, 0)),            # beta
            pl.BlockSpec((DIM, 3 * INNER), lambda i: (0, 0)),    # w_qkv (scaled)
            pl.BlockSpec((INNER, DIM), lambda i: (0, 0)),        # w_out
        ],
        out_specs=[
            pl.BlockSpec((B * N, DIM), lambda i: (0, 0)),        # out (flattened)
            pl.BlockSpec((B * N, HEADS * N), lambda i: (0, 0)),  # attn (packed)
        ],
    )

    out2d, attn_packed = pl.pallas_call(
        attention_kernel,
        out_shape=out_shapes,
        grid_spec=grid_spec,
        compiler_params=pltpu.CompilerParams(
            dimension_semantics=("arbitrary",)),
    )(x2d, gamma2, beta2, w_qkv_scaled, w_out)

    out = out2d.reshape(B, N, DIM)
    # attn_packed[b*N + i, h*N + j] == attn[b, h, i, j]
    attn = attn_packed.reshape(B, N, HEADS, N).transpose(0, 2, 1, 3)
    return out, attn


def reference(x, gamma, beta, w_qkv, w_out):
    """Pure-JAX reference mirroring the PyTorch forward (unscaled w_qkv)."""
    mean = jnp.mean(x, axis=-1, keepdims=True)
    var = jnp.mean((x - mean) ** 2, axis=-1, keepdims=True)
    xn = (x - mean) / jnp.sqrt(var + LN_EPS) * gamma + beta
    qkv = xn @ w_qkv                                        # (B, N, 3*INNER)
    q, k, v = jnp.split(qkv, 3, axis=-1)
    def split_heads(t):                                     # b n (h d) -> b h n d
        return t.reshape(B, N, HEADS, DIM_HEAD).transpose(0, 2, 1, 3)
    q, k, v = map(split_heads, (q, k, v))
    dots = jnp.einsum("bhqd,bhkd->bhqk", q, k) * SCALE
    attn = jax.nn.softmax(dots, axis=-1)
    out = jnp.einsum("bhqk,bhkd->bhqd", attn, v)
    out = out.transpose(0, 2, 1, 3).reshape(B, N, INNER)    # b h n d -> b n (h d)
    return out @ w_out, attn


if __name__ == "__main__":
    key = jax.random.PRNGKey(0)
    kx, kq, ko = jax.random.split(key, 3)

    x = jax.random.normal(kx, (B, N, DIM), dtype=jnp.float32)

    # Deterministic parameter init (LayerNorm: gamma=1, beta=0 like PyTorch).
    gamma = jnp.ones((DIM,), dtype=jnp.float32)
    beta = jnp.zeros((DIM,), dtype=jnp.float32)
    # Linear weights stored as (in, out) so the kernel computes x @ W.
    w_qkv = jax.random.normal(kq, (DIM, 3 * INNER), dtype=jnp.float32) * 0.05
    w_out = jax.random.normal(ko, (INNER, DIM), dtype=jnp.float32) * 0.05

    # Fold the softmax scale into the Q columns once, at init.
    w_qkv_scaled = fold_scale_into_q(w_qkv)

    out, attn = attention_simple(x, gamma, beta, w_qkv_scaled, w_out)
    out, attn = jax.block_until_ready((out, attn))

    ref_out, ref_attn = reference(x, gamma, beta, w_qkv, w_out)
    assert out.shape == (B, N, DIM) and attn.shape == (B, HEADS, N, N)
    # Tolerances relaxed vs. the exact version because the softmax denominator
    # uses the EUP approx reciprocal (pl.reciprocal(..., approx=True)).
    assert jnp.allclose(out, ref_out, atol=5e-3, rtol=5e-3)
    assert jnp.allclose(attn, ref_attn, atol=5e-3, rtol=5e-3)

    print("KERNEL_OK")
</pallas_src>

<mosaic_0001>
module attributes {stable_mosaic.version = 11 : i64} {
  func.func @attention_kernel(%arg0: i32, %arg1: memref<16x32xf32, #tpu.memory_space<vmem>>, %arg2: memref<1x32xf32, #tpu.memory_space<vmem>>, %arg3: memref<1x32xf32, #tpu.memory_space<vmem>>, %arg4: memref<32x192xf32, #tpu.memory_space<vmem>>, %arg5: memref<64x32xf32, #tpu.memory_space<vmem>>, %arg6: memref<16x32xf32, #tpu.memory_space<vmem>>, %arg7: memref<16x32xf32, #tpu.memory_space<vmem>>) attributes {dimension_semantics = [#tpu.dimension_semantics<arbitrary>], iteration_bounds = array<i64: 1>, scalar_prefetch = 0 : i64, scratch_operands = 0 : i64, tpu.core_type = #tpu.core_type<tc>, window_params = [{pipeline_mode = #tpu.pipeline_mode<synchronous>, transform_indices = @transform_0, window_bounds = array<i64: 16, 32>}, {pipeline_mode = #tpu.pipeline_mode<synchronous>, transform_indices = @transform_1, window_bounds = array<i64: 1, 32>}, {pipeline_mode = #tpu.pipeline_mode<synchronous>, transform_indices = @transform_2, window_bounds = array<i64: 1, 32>}, {pipeline_mode = #tpu.pipeline_mode<synchronous>, transform_indices = @transform_3, window_bounds = array<i64: 32, 192>}, {pipeline_mode = #tpu.pipeline_mode<synchronous>, transform_indices = @transform_4, window_bounds = array<i64: 64, 32>}, {pipeline_mode = #tpu.pipeline_mode<synchronous>, transform_indices = @transform_5, window_bounds = array<i64: 16, 32>}, {pipeline_mode = #tpu.pipeline_mode<synchronous>, transform_indices = @transform_6, window_bounds = array<i64: 16, 32>}]} {
    %c0 = arith.constant 0 : index
    %c0_0 = arith.constant 0 : index
    %0 = vector.load %arg1[%c0, %c0_0] : memref<16x32xf32, #tpu.memory_space<vmem>>, vector<16x32xf32>
    %cst = arith.constant dense<0.000000e+00> : vector<16xf32>
    %1 = vector.multi_reduction <add>, %0, %cst [1] : vector<16x32xf32> to vector<16xf32>
    %2 = vector.shape_cast %1 : vector<16xf32> to vector<16x1xf32>
    %cst_1 = arith.constant 3.200000e+01 : f32
    %3 = vector.broadcast %cst_1 : f32 to vector<16x1xf32>
    %4 = arith.divf %2, %3 : vector<16x1xf32>
    %5 = vector.broadcast %4 : vector<16x1xf32> to vector<16x32xf32>
    %6 = arith.subf %0, %5 : vector<16x32xf32>
    %7 = arith.mulf %6, %6 : vector<16x32xf32>
    %cst_2 = arith.constant dense<0.000000e+00> : vector<16xf32>
    %8 = vector.multi_reduction <add>, %7, %cst_2 [1] : vector<16x32xf32> to vector<16xf32>
    %9 = vector.shape_cast %8 : vector<16xf32> to vector<16x1xf32>
    %cst_3 = arith.constant 3.200000e+01 : f32
    %10 = vector.broadcast %cst_3 : f32 to vector<16x1xf32>
    %11 = arith.divf %9, %10 : vector<16x1xf32>
    %12 = vector.broadcast %4 : vector<16x1xf32> to vector<16x32xf32>
    %13 = arith.subf %0, %12 : vector<16x32xf32>
    %cst_4 = arith.constant 9.99999974E-6 : f32
    %14 = vector.broadcast %cst_4 : f32 to vector<16x1xf32>
    %15 = arith.addf %11, %14 : vector<16x1xf32>
    %16 = math.rsqrt %15 : vector<16x1xf32>
    %17 = vector.broadcast %16 : vector<16x1xf32> to vector<16x32xf32>
    %18 = arith.mulf %13, %17 : vector<16x32xf32>
    %c0_5 = arith.constant 0 : index
    %c0_6 = arith.constant 0 : index
    %19 = vector.load %arg2[%c0_5, %c0_6] : memref<1x32xf32, #tpu.memory_space<vmem>>, vector<1x32xf32>
    %20 = vector.broadcast %19 : vector<1x32xf32> to vector<16x32xf32>
    %21 = arith.mulf %18, %20 : vector<16x32xf32>
    %c0_7 = arith.constant 0 : index
    %c0_8 = arith.constant 0 : index
    %22 = vector.load %arg3[%c0_7, %c0_8] : memref<1x32xf32, #tpu.memory_space<vmem>>, vector<1x32xf32>
    %23 = vector.broadcast %22 : vector<1x32xf32> to vector<16x32xf32>
    %24 = arith.addf %21, %23 : vector<16x32xf32>
    %c0_9 = arith.constant 0 : index
    %c0_10 = arith.constant 0 : index
    %25 = vector.load %arg4[%c0_9, %c0_10] : memref<32x192xf32, #tpu.memory_space<vmem>>, vector<32x192xf32>
    %cst_11 = arith.constant dense<0.000000e+00> : vector<16x192xf32>
    %26 = tpu.matmul %24, %25, %cst_11 {dimension_numbers = #tpu.dot_dimension_numbers<[1], [0], [0], [1], [0, 0, 1, 1], [], []>} : vector<16x32xf32>, vector<32x192xf32>, vector<16x192xf32> -> vector<16x192xf32>
    %c0_12 = arith.constant 0 : index
    %c0_13 = arith.constant 0 : index
    %27 = vector.load %arg5[%c0_12, %c0_13] : memref<64x32xf32, #tpu.memory_space<vmem>>, vector<64x32xf32>
    %28 = vector.extract_strided_slice %26 {offsets = [0, 0], sizes = [8, 16], strides = [1, 1]} : vector<16x192xf32> to vector<8x16xf32>
    %29 = vector.extract_strided_slice %26 {offsets = [0, 64], sizes = [8, 16], strides = [1, 1]} : vector<16x192xf32> to vector<8x16xf32>
    %30 = tpu.transpose %29, [1, 0] : vector<8x16xf32> -> vector<16x8xf32>
    %cst_14 = arith.constant dense<0.000000e+00> : vector<8x8xf32>
    %31 = tpu.matmul %28, %30, %cst_14 {dimension_numbers = #tpu.dot_dimension_numbers<[1], [0], [0], [1], [0, 0, 1, 1], [], []>} : vector<8x16xf32>, vector<16x8xf32>, vector<8x8xf32> -> vector<8x8xf32>
    %32 = vector.extract_strided_slice %26 {offsets = [0, 16], sizes = [8, 16], strides = [1, 1]} : vector<16x192xf32> to vector<8x16xf32>
    %33 = vector.extract_strided_slice %26 {offsets = [0, 80], sizes = [8, 16], strides = [1, 1]} : vector<16x192xf32> to vector<8x16xf32>
    %34 = tpu.transpose %33, [1, 0] : vector<8x16xf32> -> vector<16x8xf32>
    %cst_15 = arith.constant dense<0.000000e+00> : vector<8x8xf32>
    %35 = tpu.matmul %32, %34, %cst_15 {dimension_numbers = #tpu.dot_dimension_numbers<[1], [0], [0], [1], [0, 0, 1, 1], [], []>} : vector<8x16xf32>, vector<16x8xf32>, vector<8x8xf32> -> vector<8x8xf32>
    %36 = vector.extract_strided_slice %26 {offsets = [0, 32], sizes = [8, 16], strides = [1, 1]} : vector<16x192xf32> to vector<8x16xf32>
    %37 = vector.extract_strided_slice %26 {offsets = [0, 96], sizes = [8, 16], strides = [1, 1]} : vector<16x192xf32> to vector<8x16xf32>
    %38 = tpu.transpose %37, [1, 0] : vector<8x16xf32> -> vector<16x8xf32>
    %cst_16 = arith.constant dense<0.000000e+00> : vector<8x8xf32>
    %39 = tpu.matmul %36, %38, %cst_16 {dimension_numbers = #tpu.dot_dimension_numbers<[1], [0], [0], [1], [0, 0, 1, 1], [], []>} : vector<8x16xf32>, vector<16x8xf32>, vector<8x8xf32> -> vector<8x8xf32>
    %40 = vector.extract_strided_slice %26 {offsets = [0, 48], sizes = [8, 16], strides = [1, 1]} : vector<16x192xf32> to vector<8x16xf32>
    %41 = vector.extract_strided_slice %26 {offsets = [0, 112], sizes = [8, 16], strides = [1, 1]} : vector<16x192xf32> to vector<8x16xf32>
    %42 = tpu.transpose %41, [1, 0] : vector<8x16xf32> -> vector<16x8xf32>
    %cst_17 = arith.constant dense<0.000000e+00> : vector<8x8xf32>
    %43 = tpu.matmul %40, %42, %cst_17 {dimension_numbers = #tpu.dot_dimension_numbers<[1], [0], [0], [1], [0, 0, 1, 1], [], []>} : vector<8x16xf32>, vector<16x8xf32>, vector<8x8xf32> -> vector<8x8xf32>
    %44 = vector.extract_strided_slice %26 {offsets = [8, 0], sizes = [8, 16], strides = [1, 1]} : vector<16x192xf32> to vector<8x16xf32>
    %45 = vector.extract_strided_slice %26 {offsets = [8, 64], sizes = [8, 16], strides = [1, 1]} : vector<16x192xf32> to vector<8x16xf32>
    %46 = tpu.transpose %45, [1, 0] : vector<8x16xf32> -> vector<16x8xf32>
    %cst_18 = arith.constant dense<0.000000e+00> : vector<8x8xf32>
    %47 = tpu.matmul %44, %46, %cst_18 {dimension_numbers = #tpu.dot_dimension_numbers<[1], [0], [0], [1], [0, 0, 1, 1], [], []>} : vector<8x16xf32>, vector<16x8xf32>, vector<8x8xf32> -> vector<8x8xf32>
    %48 = vector.extract_strided_slice %26 {offsets = [8, 16], sizes = [8, 16], strides = [1, 1]} : vector<16x192xf32> to vector<8x16xf32>
    %49 = vector.extract_strided_slice %26 {offsets = [8, 80], sizes = [8, 16], strides = [1, 1]} : vector<16x192xf32> to vector<8x16xf32>
    %50 = tpu.transpose %49, [1, 0] : vector<8x16xf32> -> vector<16x8xf32>
    %cst_19 = arith.constant dense<0.000000e+00> : vector<8x8xf32>
    %51 = tpu.matmul %48, %50, %cst_19 {dimension_numbers = #tpu.dot_dimension_numbers<[1], [0], [0], [1], [0, 0, 1, 1], [], []>} : vector<8x16xf32>, vector<16x8xf32>, vector<8x8xf32> -> vector<8x8xf32>
    %52 = vector.extract_strided_slice %26 {offsets = [8, 32], sizes = [8, 16], strides = [1, 1]} : vector<16x192xf32> to vector<8x16xf32>
    %53 = vector.extract_strided_slice %26 {offsets = [8, 96], sizes = [8, 16], strides = [1, 1]} : vector<16x192xf32> to vector<8x16xf32>
    %54 = tpu.transpose %53, [1, 0] : vector<8x16xf32> -> vector<16x8xf32>
    %cst_20 = arith.constant dense<0.000000e+00> : vector<8x8xf32>
    %55 = tpu.matmul %52, %54, %cst_20 {dimension_numbers = #tpu.dot_dimension_numbers<[1], [0], [0], [1], [0, 0, 1, 1], [], []>} : vector<8x16xf32>, vector<16x8xf32>, vector<8x8xf32> -> vector<8x8xf32>
    %56 = vector.extract_strided_slice %26 {offsets = [8, 48], sizes = [8, 16], strides = [1, 1]} : vector<16x192xf32> to vector<8x16xf32>
    %57 = vector.extract_strided_slice %26 {offsets = [8, 112], sizes = [8, 16], strides = [1, 1]} : vector<16x192xf32> to vector<8x16xf32>
    %58 = tpu.transpose %57, [1, 0] : vector<8x16xf32> -> vector<16x8xf32>
    %cst_21 = arith.constant dense<0.000000e+00> : vector<8x8xf32>
    %59 = tpu.matmul %56, %58, %cst_21 {dimension_numbers = #tpu.dot_dimension_numbers<[1], [0], [0], [1], [0, 0, 1, 1], [], []>} : vector<8x16xf32>, vector<16x8xf32>, vector<8x8xf32> -> vector<8x8xf32>
    %60 = tpu.concatenate %31, %35, %39, %43, %47, %51, %55, %59 in 0 : vector<8x8xf32>, vector<8x8xf32>, vector<8x8xf32>, vector<8x8xf32>, vector<8x8xf32>, vector<8x8xf32>, vector<8x8xf32>, vector<8x8xf32> -> vector<64x8xf32>
    %cst_22 = arith.constant dense<0xFF800000> : vector<64xf32>
    %61 = vector.multi_reduction <maximumf>, %60, %cst_22 [1] : vector<64x8xf32> to vector<64xf32>
    %62 = vector.shape_cast %61 : vector<64xf32> to vector<64x1xf32>
    %63 = vector.broadcast %62 : vector<64x1xf32> to vector<64x8xf32>
    %64 = arith.subf %60, %63 : vector<64x8xf32>
    %65 = math.exp %64 : vector<64x8xf32>
    %cst_23 = arith.constant dense<0.000000e+00> : vector<64xf32>
    %66 = vector.multi_reduction <add>, %65, %cst_23 [1] : vector<64x8xf32> to vector<64xf32>
    %67 = vector.shape_cast %66 : vector<64xf32> to vector<64x1xf32>
    %68 = tpu.reciprocal %67 {approx = true} : vector<64x1xf32> -> vector<64x1xf32>
    %69 = vector.broadcast %68 : vector<64x1xf32> to vector<64x8xf32>
    %70 = arith.mulf %65, %69 : vector<64x8xf32>
    %cst_24 = arith.constant 0.000000e+00 : f32
    %71 = vector.broadcast %cst_24 : f32 to vector<8x32xf32>
    %72 = vector.extract_strided_slice %70 {offsets = [0, 0], sizes = [8, 8], strides = [1, 1]} : vector<64x8xf32> to vector<8x8xf32>
    %c0_25 = arith.constant 0 : index
    %c0_26 = arith.constant 0 : index
    %73 = vector.load %arg7[%c0_25, %c0_26] : memref<16x32xf32, #tpu.memory_space<vmem>>, vector<8x8xf32>
    tpu.vector_store %arg7[%c0_25, %c0_26], %72 {strides = array<i32>} : memref<16x32xf32, #tpu.memory_space<vmem>>, vector<8x8xf32>,
    %74 = vector.extract_strided_slice %26 {offsets = [0, 128], sizes = [8, 16], strides = [1, 1]} : vector<16x192xf32> to vector<8x16xf32>
    %cst_27 = arith.constant dense<0.000000e+00> : vector<8x16xf32>
    %75 = tpu.matmul %72, %74, %cst_27 {dimension_numbers = #tpu.dot_dimension_numbers<[1], [0], [0], [1], [0, 0, 1, 1], [], []>} : vector<8x8xf32>, vector<8x16xf32>, vector<8x16xf32> -> vector<8x16xf32>
    %76 = vector.extract_strided_slice %27 {offsets = [0, 0], sizes = [16, 32], strides = [1, 1]} : vector<64x32xf32> to vector<16x32xf32>
    %cst_28 = arith.constant dense<0.000000e+00> : vector<8x32xf32>
    %77 = tpu.matmul %75, %76, %cst_28 {dimension_numbers = #tpu.dot_dimension_numbers<[1], [0], [0], [1], [0, 0, 1, 1], [], []>} : vector<8x16xf32>, vector<16x32xf32>, vector<8x32xf32> -> vector<8x32xf32>
    %78 = arith.addf %71, %77 : vector<8x32xf32>
    %79 = vector.extract_strided_slice %70 {offsets = [8, 0], sizes = [8, 8], strides = [1, 1]} : vector<64x8xf32> to vector<8x8xf32>
    %c0_29 = arith.constant 0 : index
    %c8 = arith.constant 8 : index
    %80 = vector.load %arg7[%c0_29, %c8] : memref<16x32xf32, #tpu.memory_space<vmem>>, vector<8x8xf32>
    tpu.vector_store %arg7[%c0_29, %c8], %79 {strides = array<i32>} : memref<16x32xf32, #tpu.memory_space<vmem>>, vector<8x8xf32>,
    %81 = vector.extract_strided_slice %26 {offsets = [0, 144], sizes = [8, 16], strides = [1, 1]} : vector<16x192xf32> to vector<8x16xf32>
    %cst_30 = arith.constant dense<0.000000e+00> : vector<8x16xf32>
    %82 = tpu.matmul %79, %81, %cst_30 {dimension_numbers = #tpu.dot_dimension_numbers<[1], [0], [0], [1], [0, 0, 1, 1], [], []>} : vector<8x8xf32>, vector<8x16xf32>, vector<8x16xf32> -> vector<8x16xf32>
    %83 = vector.extract_strided_slice %27 {offsets = [16, 0], sizes = [16, 32], strides = [1, 1]} : vector<64x32xf32> to vector<16x32xf32>
    %cst_31 = arith.constant dense<0.000000e+00> : vector<8x32xf32>
    %84 = tpu.matmul %82, %83, %cst_31 {dimension_numbers = #tpu.dot_dimension_numbers<[1], [0], [0], [1], [0, 0, 1, 1], [], []>} : vector<8x16xf32>, vector<16x32xf32>, vector<8x32xf32> -> vector<8x32xf32>
    %85 = arith.addf %78, %84 : vector<8x32xf32>
    %86 = vector.extract_strided_slice %70 {offsets = [16, 0], sizes = [8, 8], strides = [1, 1]} : vector<64x8xf32> to vector<8x8xf32>
    %c0_32 = arith.constant 0 : index
    %c16 = arith.constant 16 : index
    %87 = vector.load %arg7[%c0_32, %c16] : memref<16x32xf32, #tpu.memory_space<vmem>>, vector<8x8xf32>
    tpu.vector_store %arg7[%c0_32, %c16], %86 {strides = array<i32>} : memref<16x32xf32, #tpu.memory_space<vmem>>, vector<8x8xf32>,
    %88 = vector.extract_strided_slice %26 {offsets = [0, 160], sizes = [8, 16], strides = [1, 1]} : vector<16x192xf32> to vector<8x16xf32>
    %cst_33 = arith.constant dense<0.000000e+00> : vector<8x16xf32>
    %89 = tpu.matmul %86, %88, %cst_33 {dimension_numbers = #tpu.dot_dimension_numbers<[1], [0], [0], [1], [0, 0, 1, 1], [], []>} : vector<8x8xf32>, vector<8x16xf32>, vector<8x16xf32> -> vector<8x16xf32>
    %90 = vector.extract_strided_slice %27 {offsets = [32, 0], sizes = [16, 32], strides = [1, 1]} : vector<64x32xf32> to vector<16x32xf32>
    %cst_34 = arith.constant dense<0.000000e+00> : vector<8x32xf32>
    %91 = tpu.matmul %89, %90, %cst_34 {dimension_numbers = #tpu.dot_dimension_numbers<[1], [0], [0], [1], [0, 0, 1, 1], [], []>} : vector<8x16xf32>, vector<16x32xf32>, vector<8x32xf32> -> vector<8x32xf32>
    %92 = arith.addf %85, %91 : vector<8x32xf32>
    %93 = vector.extract_strided_slice %70 {offsets = [24, 0], sizes = [8, 8], strides = [1, 1]} : vector<64x8xf32> to vector<8x8xf32>
    %c0_35 = arith.constant 0 : index
    %c24 = arith.constant 24 : index
    %94 = vector.load %arg7[%c0_35, %c24] : memref<16x32xf32, #tpu.memory_space<vmem>>, vector<8x8xf32>
    tpu.vector_store %arg7[%c0_35, %c24], %93 {strides = array<i32>} : memref<16x32xf32, #tpu.memory_space<vmem>>, vector<8x8xf32>,
    %95 = vector.extract_strided_slice %26 {offsets = [0, 176], sizes = [8, 16], strides = [1, 1]} : vector<16x192xf32> to vector<8x16xf32>
    %cst_36 = arith.constant dense<0.000000e+00> : vector<8x16xf32>
    %96 = tpu.matmul %93, %95, %cst_36 {dimension_numbers = #tpu.dot_dimension_numbers<[1], [0], [0], [1], [0, 0, 1, 1], [], []>} : vector<8x8xf32>, vector<8x16xf32>, vector<8x16xf32> -> vector<8x16xf32>
    %97 = vector.extract_strided_slice %27 {offsets = [48, 0], sizes = [16, 32], strides = [1, 1]} : vector<64x32xf32> to vector<16x32xf32>
    %cst_37 = arith.constant dense<0.000000e+00> : vector<8x32xf32>
    %98 = tpu.matmul %96, %97, %cst_37 {dimension_numbers = #tpu.dot_dimension_numbers<[1], [0], [0], [1], [0, 0, 1, 1], [], []>} : vector<8x16xf32>, vector<16x32xf32>, vector<8x32xf32> -> vector<8x32xf32>
    %99 = arith.addf %92, %98 : vector<8x32xf32>
    %c0_38 = arith.constant 0 : index
    %c0_39 = arith.constant 0 : index
    %100 = vector.load %arg6[%c0_38, %c0_39] : memref<16x32xf32, #tpu.memory_space<vmem>>, vector<8x32xf32>
    tpu.vector_store %arg6[%c0_38, %c0_39], %99 {strides = array<i32>} : memref<16x32xf32, #tpu.memory_space<vmem>>, vector<8x32xf32>,
    %cst_40 = arith.constant 0.000000e+00 : f32
    %101 = vector.broadcast %cst_40 : f32 to vector<8x32xf32>
    %102 = vector.extract_strided_slice %70 {offsets = [32, 0], sizes = [8, 8], strides = [1, 1]} : vector<64x8xf32> to vector<8x8xf32>
    %c8_41 = arith.constant 8 : index
    %c0_42 = arith.constant 0 : index
    %103 = vector.load %arg7[%c8_41, %c0_42] : memref<16x32xf32, #tpu.memory_space<vmem>>, vector<8x8xf32>
    tpu.vector_store %arg7[%c8_41, %c0_42], %102 {strides = array<i32>} : memref<16x32xf32, #tpu.memory_space<vmem>>, vector<8x8xf32>,
    %104 = vector.extract_strided_slice %26 {offsets = [8, 128], sizes = [8, 16], strides = [1, 1]} : vector<16x192xf32> to vector<8x16xf32>
    %cst_43 = arith.constant dense<0.000000e+00> : vector<8x16xf32>
    %105 = tpu.matmul %102, %104, %cst_43 {dimension_numbers = #tpu.dot_dimension_numbers<[1], [0], [0], [1], [0, 0, 1, 1], [], []>} : vector<8x8xf32>, vector<8x16xf32>, vector<8x16xf32> -> vector<8x16xf32>
    %106 = vector.extract_strided_slice %27 {offsets = [0, 0], sizes = [16, 32], strides = [1, 1]} : vector<64x32xf32> to vector<16x32xf32>
    %cst_44 = arith.constant dense<0.000000e+00> : vector<8x32xf32>
    %107 = tpu.matmul %105, %106, %cst_44 {dimension_numbers = #tpu.dot_dimension_numbers<[1], [0], [0], [1], [0, 0, 1, 1], [], []>} : vector<8x16xf32>, vector<16x32xf32>, vector<8x32xf32> -> vector<8x32xf32>
    %108 = arith.addf %101, %107 : vector<8x32xf32>
    %109 = vector.extract_strided_slice %70 {offsets = [40, 0], sizes = [8, 8], strides = [1, 1]} : vector<64x8xf32> to vector<8x8xf32>
    %c8_45 = arith.constant 8 : index
    %c8_46 = arith.constant 8 : index
    %110 = vector.load %arg7[%c8_45, %c8_46] : memref<16x32xf32, #tpu.memory_space<vmem>>, vector<8x8xf32>
    tpu.vector_store %arg7[%c8_45, %c8_46], %109 {strides = array<i32>} : memref<16x32xf32, #tpu.memory_space<vmem>>, vector<8x8xf32>,
    %111 = vector.extract_strided_slice %26 {offsets = [8, 144], sizes = [8, 16], strides = [1, 1]} : vector<16x192xf32> to vector<8x16xf32>
    %cst_47 = arith.constant dense<0.000000e+00> : vector<8x16xf32>
    %112 = tpu.matmul %109, %111, %cst_47 {dimension_numbers = #tpu.dot_dimension_numbers<[1], [0], [0], [1], [0, 0, 1, 1], [], []>} : vector<8x8xf32>, vector<8x16xf32>, vector<8x16xf32> -> vector<8x16xf32>
    %113 = vector.extract_strided_slice %27 {offsets = [16, 0], sizes = [16, 32], strides = [1, 1]} : vector<64x32xf32> to vector<16x32xf32>
    %cst_48 = arith.constant dense<0.000000e+00> : vector<8x32xf32>
    %114 = tpu.matmul %112, %113, %cst_48 {dimension_numbers = #tpu.dot_dimension_numbers<[1], [0], [0], [1], [0, 0, 1, 1], [], []>} : vector<8x16xf32>, vector<16x32xf32>, vector<8x32xf32> -> vector<8x32xf32>
    %115 = arith.addf %108, %114 : vector<8x32xf32>
    %116 = vector.extract_strided_slice %70 {offsets = [48, 0], sizes = [8, 8], strides = [1, 1]} : vector<64x8xf32> to vector<8x8xf32>
    %c8_49 = arith.constant 8 : index
    %c16_50 = arith.constant 16 : index
    %117 = vector.load %arg7[%c8_49, %c16_50] : memref<16x32xf32, #tpu.memory_space<vmem>>, vector<8x8xf32>
    tpu.vector_store %arg7[%c8_49, %c16_50], %116 {strides = array<i32>} : memref<16x32xf32, #tpu.memory_space<vmem>>, vector<8x8xf32>,
    %118 = vector.extract_strided_slice %26 {offsets = [8, 160], sizes = [8, 16], strides = [1, 1]} : vector<16x192xf32> to vector<8x16xf32>
    %cst_51 = arith.constant dense<0.000000e+00> : vector<8x16xf32>
    %119 = tpu.matmul %116, %118, %cst_51 {dimension_numbers = #tpu.dot_dimension_numbers<[1], [0], [0], [1], [0, 0, 1, 1], [], []>} : vector<8x8xf32>, vector<8x16xf32>, vector<8x16xf32> -> vector<8x16xf32>
    %120 = vector.extract_strided_slice %27 {offsets = [32, 0], sizes = [16, 32], strides = [1, 1]} : vector<64x32xf32> to vector<16x32xf32>
    %cst_52 = arith.constant dense<0.000000e+00> : vector<8x32xf32>
    %121 = tpu.matmul %119, %120, %cst_52 {dimension_numbers = #tpu.dot_dimension_numbers<[1], [0], [0], [1], [0, 0, 1, 1], [], []>} : vector<8x16xf32>, vector<16x32xf32>, vector<8x32xf32> -> vector<8x32xf32>
    %122 = arith.addf %115, %121 : vector<8x32xf32>
    %123 = vector.extract_strided_slice %70 {offsets = [56, 0], sizes = [8, 8], strides = [1, 1]} : vector<64x8xf32> to vector<8x8xf32>
    %c8_53 = arith.constant 8 : index
    %c24_54 = arith.constant 24 : index
    %124 = vector.load %arg7[%c8_53, %c24_54] : memref<16x32xf32, #tpu.memory_space<vmem>>, vector<8x8xf32>
    tpu.vector_store %arg7[%c8_53, %c24_54], %123 {strides = array<i32>} : memref<16x32xf32, #tpu.memory_space<vmem>>, vector<8x8xf32>,
    %125 = vector.extract_strided_slice %26 {offsets = [8, 176], sizes = [8, 16], strides = [1, 1]} : vector<16x192xf32> to vector<8x16xf32>
    %cst_55 = arith.constant dense<0.000000e+00> : vector<8x16xf32>
    %126 = tpu.matmul %123, %125, %cst_55 {dimension_numbers = #tpu.dot_dimension_numbers<[1], [0], [0], [1], [0, 0, 1, 1], [], []>} : vector<8x8xf32>, vector<8x16xf32>, vector<8x16xf32> -> vector<8x16xf32>
    %127 = vector.extract_strided_slice %27 {offsets = [48, 0], sizes = [16, 32], strides = [1, 1]} : vector<64x32xf32> to vector<16x32xf32>
    %cst_56 = arith.constant dense<0.000000e+00> : vector<8x32xf32>
    %128 = tpu.matmul %126, %127, %cst_56 {dimension_numbers = #tpu.dot_dimension_numbers<[1], [0], [0], [1], [0, 0, 1, 1], [], []>} : vector<8x16xf32>, vector<16x32xf32>, vector<8x32xf32> -> vector<8x32xf32>
    %129 = arith.addf %122, %128 : vector<8x32xf32>
    %c8_57 = arith.constant 8 : index
    %c0_58 = arith.constant 0 : index
    %130 = vector.load %arg6[%c8_57, %c0_58] : memref<16x32xf32, #tpu.memory_space<vmem>>, vector<8x32xf32>
    tpu.vector_store %arg6[%c8_57, %c0_58], %129 {strides = array<i32>} : memref<16x32xf32, #tpu.memory_space<vmem>>, vector<8x32xf32>,
    return
  }
  func.func @transform_0(%arg0: i32) -> (i32, i32) {
    %c0_i32 = arith.constant 0 : i32
    %c0_i32_0 = arith.constant 0 : i32
    %c0_i32_1 = arith.constant 0 : i32
    return %c0_i32, %c0_i32_0 : i32, i32
  }
  func.func @transform_1(%arg0: i32) -> (i32, i32) {
    %c0_i32 = arith.constant 0 : i32
    %c0_i32_0 = arith.constant 0 : i32
    %c0_i32_1 = arith.constant 0 : i32
    return %c0_i32, %c0_i32_0 : i32, i32
  }
  func.func @transform_2(%arg0: i32) -> (i32, i32) {
    %c0_i32 = arith.constant 0 : i32
    %c0_i32_0 = arith.constant 0 : i32
    %c0_i32_1 = arith.constant 0 : i32
    return %c0_i32, %c0_i32_0 : i32, i32
  }
  func.func @transform_3(%arg0: i32) -> (i32, i32) {
    %c0_i32 = arith.constant 0 : i32
    %c0_i32_0 = arith.constant 0 : i32
    %c0_i32_1 = arith.constant 0 : i32
    return %c0_i32, %c0_i32_0 : i32, i32
  }
  func.func @transform_4(%arg0: i32) -> (i32, i32) {
    %c0_i32 = arith.constant 0 : i32
    %c0_i32_0 = arith.constant 0 : i32
    %c0_i32_1 = arith.constant 0 : i32
    return %c0_i32, %c0_i32_0 : i32, i32
  }
  func.func @transform_5(%arg0: i32) -> (i32, i32) {
    %c0_i32 = arith.constant 0 : i32
    %c0_i32_0 = arith.constant 0 : i32
    %c0_i32_1 = arith.constant 0 : i32
    return %c0_i32, %c0_i32_0 : i32, i32
  }
  func.func @transform_6(%arg0: i32) -> (i32, i32) {
    %c0_i32 = arith.constant 0 : i32
    %c0_i32_0 = arith.constant 0 : i32
    %c0_i32_1 = arith.constant 0 : i32
    return %c0_i32, %c0_i32_0 : i32, i32
  }
}

</mosaic_0001>

<bundles_post_ra>
// kernel: tpu_custom_call.1
= control target key start
LH: loop header
LB: loop body
LE: loop exit
PB: predicated region body
PF: predicated region fallthrough
CT: control target
= control target key end

     0   :  { %12 = vsyncpa [#allocation3], 0  ;;  %vm26_vm0 = vcmask 261120   ;;  %s2826_s0 = inlined_call_operand.vmem [shape: f32[16,32], index: 0, kind: input, shape index: {}]   ;;  %s2827_s1 = inlined_call_operand.vmem [shape: f32[1,32], index: 1, kind: input, shape index: {}]   ;;  %s2828_s2 = inlined_call_operand.vmem [shape: f32[1,32], index: 2, kind: input, shape index: {}]   ;;  %s2829_s3 = inlined_call_operand.vmem [shape: f32[32,192], index: 3, kind: input, shape index: {}]   ;;  %s2830_s4 = inlined_call_operand.vmem [shape: f32[64,32], index: 4, kind: input, shape index: {}]   ;;  %s2831_s5 = inlined_call_operand.hbm [shape: f32[16,32], index: 5, kind: output, shape index: {0}]   ;;  %s2832_s6 = inlined_call_operand.hbm [shape: f32[16,32], index: 6, kind: output, shape index: {1}]  }
   0x1   :  { %v24_v0 = vld [vmem:[%s2826_s0] sm:$0xff] }
   0x2   :  { %13 = vsyncpa [#allocation5], 0  ;;  %v27_v1 = vsel %vm26_vm0, %v24_v0, 0.0  ;;  %v79_v7 = vld [vmem:[%s2829_s3 + $0x38] sm:$0xff]  ;;  %v78_v8 = vld [vmem:[%s2829_s3 + $0x30] sm:$0xff]  ;;  %v2460_v11 = vmov 0.0  }
   0x3   :  { %28 = vadd.xlane.f32.xlu0 %v27_v1  ;;  %v77_v9 = vld [vmem:[%s2829_s3 + $0x28] sm:$0xff]  ;;  %110 = vmatprep.subr.mxu0 %v79_v7  ;;  %v76_v10 = vld [vmem:[%s2829_s3 + $0x20] sm:$0xff]  ;;  %v75_v12 = vld [vmem:[%s2829_s3 + $0x18] sm:$0xff]  ;;  %vm2461_vm1 = vmmov 0   ;;  %s2465_s21 = smov 32   ;;  %s2466_s22 = smov 96  }
   0x4   :  { %150 = vmatprep.mubr.f32.mxu0 %v2460_v11  ;;  %111 = vmatpush1.msra.mxu0 %v78_v8  ;;  %v74_v13 = vld [vmem:[%s2829_s3 + $0x10] sm:$0xff]  ;;  %v73_v14 = vld [vmem:[%s2829_s3 + $0x8] sm:$0xff]  ;;  %v72_v15 = vld [vmem:[%s2829_s3] sm:$0xff]  ;;  %s2463_s3 = smov 64   ;;  %s2467_s23 = smov 16   ;;  %vm174_vm2 = vcmask 130048  }
   0x5   :  { %2230 = vmatprep.subr.mxu1 %v2460_v11  ;;  %112 = vmatprep.subr.mxu0 %v77_v9  ;;  %v2544_v20 = vld [vmem:[%s2827_s1] ss:$0 sm:$0xff]  ;;  %s2462_s1 = smov 48   ;;  %v25_v26 = vld [vmem:[%s2826_s0 + $0x8] sm:$0xff]  ;;  %s2468_s0 = smov 80   ;;  %vm794_vm3 = vcmask 64512  }
   0x6   :  { %113 = vmatpush1.msra.mxu0 %v76_v10  ;;  %v2549_v22 = vld [vmem:[%s2828_s2] ss:$0 sm:$0xff]  ;;  %2232 = vmatprep.mubr.msk.f32.mxu1 %vm2461_vm1, %v2460_v11  ;;  %s2464_s2 = smov 112   ;;  %v30_v27 = vsel %vm26_vm0, %v25_v26, 0.0  ;;  %s2470_s16 = smov 24   ;;  %vm961_vm4 = vcmask 130112  }
   0x7   :  { %114 = vmatprep.subr.mxu0 %v75_v12  ;;  %vm1189_vm5 = vcmask 195712   ;;  %vm1344_vm6 = vcmask 261312   ;;  %s2471_s17 = smov [#allocation4]  }
   0x8   :  { %115 = vmatpush1.msra.mxu0 %v74_v13  ;;  %s2123_s18 = sshll.u32 %s2471_s17, 4  ;;  %s2124_s18 = int_to_ptr.vmem [resolvable:$true] %s2123_s18 }
   0x9   :  { %116 = vmatprep.subr.mxu0 %v73_v14  ;;  %p2421_p1 = scmp.lt.s32.totalorder %s2124_s18, %s2124_s18 }
   0xa   :  { %117 = vmatpush1.msra.mxu0 %v72_v15 }
   0xb   :  { %2245 = vmatprep.subr.mxu0 %v2460_v11 }
  0x8c   :  { %v29_v2 = vpop.xlane.xlu0 %28 }
  0x8d   :  { %v34_v3 = vmul.f32 0.03125, %v29_v2 }
  0x8f   :  { %v36_v4 = vsub.f32 %v24_v0, %v34_v3 }
  0x91   :  { %v38_v5 = vmul.f32 %v36_v4, %v36_v4 }
  0x93   :  { %v40_v6 = vsel %vm26_vm0, %v38_v5, 0.0 }
  0x94   :  { %41 = vadd.xlane.f32.xlu0 %v40_v6 }
 0x11d   :  { %v42_v16 = vpop.xlane.xlu0 %41 }
 0x11e   :  { %v46_v17 = vmul.f32 0.03125, %v42_v16 }
 0x120   :  { %v48_v18 = vadd.f32 1e-05, %v46_v17 }
 0x122   :  { %2380 = vrsqrt.f32 %v48_v18 }
 0x12f   :  { %v2381_v19 = vpop.eup %2380 }
 0x130   :  { %v52_v21 = vmul.f32 %v2381_v19, %v36_v4 }
 0x132   :  { %v61_v23 = vmul.f32 %v2544_v20, %v52_v21 }
 0x134   :  { %v70_v24 = vadd.f32 %v2549_v22, %v61_v23 }
 0x136   :  { %2140 = vmatmul.mubr.msk.f32.vlgmr.msra.gmra.mxu0 %vm26_vm0, %v70_v24 }
 0x137   :  { %156 = vmatprep.mubr.f32.mxu0 %v2460_v11 }
 0x1f6   :  { %v152_v25 = vpop.f32.mrf.mxu0 }
 0x1f7   :  { %251 = vrot.lane.b32.xlu0 %v152_v25, %s2462_s1  ;;  %172 = vrot.lane.b32.xlu1 %v152_v25, %s2463_s3 }
 0x1f8   :  { %v2598_v59 = vpop.f32.mrf.mxu0 }
 0x1fb   :  { %249 = vrot.lane.b32.xlu0 %v152_v25, %s2464_s2 }
 0x21b   :  { %31 = vadd.xlane.f32.xlu1 %v30_v27 }
 0x22c   :  { %329 = vrot.lane.b32.xlu1 %v152_v25, %s2465_s21 }
 0x230   :  { %327 = vrot.lane.b32.xlu1 %v152_v25, %s2466_s22 }
 0x234   :  { %407 = vrot.lane.b32.xlu1 %v152_v25, %s2467_s23 }
 0x269   :  { %v173_v28 = vpop.permute.xlu1 %172  ;;  %v252_v29 = vpop.permute.xlu0 %251 }
 0x26a   :  { %2231 = vmatpush3.xpose.msk.msra.mxu1 %vm174_vm2, %v173_v28 }
 0x26b   :  { %2235 = vmatprep.subr.mxu1 %v2460_v11 }
 0x26d   :  { %2233 = vmatmul.mubr.msk.f32.vlgmr.msra.gmra.mxu1 %vm174_vm2, %v152_v25  ;;  %v250_v30 = vpop.permute.xlu0 %249 }
 0x26e   :  { %2236 = vmatpush3.xpose.msk.msra.mxu1 %vm174_vm2, %v252_v29  ;;  %2237 = vmatprep.mubr.msk.f32.mxu1 %vm2461_vm1, %v2460_v11 }
 0x26f   :  { %2240 = vmatprep.subr.mxu1 %v2460_v11 }
 0x271   :  { %2238 = vmatmul.mubr.msk.f32.vlgmr.msra.gmra.mxu1 %vm174_vm2, %v250_v30 }
 0x272   :  { %2242 = vmatprep.mubr.msk.f32.mxu1 %vm2461_vm1, %v2460_v11 }
 0x2a4   :  { %v32_v31 = vpop.xlane.xlu1 %31 }
 0x2a5   :  { %v35_v32 = vmul.f32 0.03125, %v32_v31 }
 0x2a7   :  { %v37_v33 = vsub.f32 %v25_v26, %v35_v32 }
 0x2a8   :  { %v330_v34 = vpop.permute.xlu1 %329 }
 0x2a9   :  { %2241 = vmatpush3.xpose.msk.msra.mxu1 %vm174_vm2, %v330_v34  ;;  %v39_v35 = vmul.f32 %v37_v33, %v37_v33 }
 0x2aa   :  { %2250 = vmatprep.subr.mxu1 %v2460_v11 }
 0x2ab   :  { %v43_v36 = vsel %vm26_vm0, %v39_v35, 0.0 }
 0x2ac   :  { %44 = vadd.xlane.f32.xlu0 %v43_v36  ;;  %v328_v37 = vpop.permute.xlu1 %327 }
 0x2ad   :  { %2243 = vmatmul.mubr.msk.f32.vlgmr.msra.gmra.mxu1 %vm174_vm2, %v328_v37 }
 0x2ae   :  { %2252 = vmatprep.mubr.msk.f32.mxu1 %vm2461_vm1, %v2460_v11 }
 0x2b0   :  { %v408_v38 = vpop.permute.xlu1 %407 }
 0x2b1   :  { %2246 = vmatpush3.xpose.msk.msra.mxu0 %vm174_vm2, %v408_v38 }
 0x2b2   :  { %2255 = vmatprep.subr.mxu0 %v2460_v11 }
 0x2c2   :  { %405 = vrot.lane.b32.xlu0 %v152_v25, %s2468_s0 }
 0x32d   :  { %v2586_v39 = vpop.f32.mrf.mxu1 }
 0x32e   :  { %v795_v1 = vsel %vm794_vm3, %v2586_v39, -inf }
 0x32f   :  { %v2234_v40 = vpop.f32.mrf.mxu1 }
 0x331   :  { %v323_v41 = vpop.f32.mrf.mxu1 }
 0x332   :  { %v798_v42 = vsel %vm794_vm3, %v323_v41, -inf }
 0x333   :  { %799 = vmax.xlane.f32.xlu1 %v798_v42  ;;  %v2239_v43 = vpop.f32.mrf.mxu1  ;;  %v2670_v42 = vld [vmem:[%s2830_s4 + $0x18] sm:$0xff] }
 0x334   :  { %v2677_v43 = vld [vmem:[%s2830_s4 + $0x10] sm:$0xff] }
 0x335   :  { %v45_v44 = vpop.xlane.xlu0 %44 }
 0x336   :  { %v47_v45 = vmul.f32 0.03125, %v45_v44 }
 0x338   :  { %v49_v46 = vadd.f32 1e-05, %v47_v45 }
 0x339   :  { %v406_v51 = vpop.permute.xlu0 %405 }
 0x33a   :  { %2382 = vrsqrt.f32 %v49_v46 }
 0x347   :  { %v2383_v47 = vpop.eup %2382 }
 0x348   :  { %v53_v48 = vmul.f32 %v2383_v47, %v37_v33 }
 0x34a   :  { %v62_v49 = vmul.f32 %v2544_v20, %v53_v48 }
 0x34c   :  { %v71_v50 = vadd.f32 %v2549_v22, %v62_v49 }
 0x34e   :  { %2141 = vmatmul.mubr.msk.f32.gmra.mxu0 %vm26_vm0, %v71_v50 }
 0x34f   :  { %2247 = vmatprep.mubr.msk.f32.mxu0 %vm2461_vm1, %v2460_v11 }
 0x352   :  { %2248 = vmatmul.mubr.msk.f32.vlgmr.msra.gmra.mxu0 %vm174_vm2, %v406_v51 }
 0x353   :  { %2257 = vmatprep.mubr.msk.f32.mxu0 %vm2461_vm1, %v2460_v11 }
 0x36d   :  { %v401_v52 = vpop.f32.mrf.mxu1 }
 0x36e   :  { %v801_v0 = vsel %vm794_vm3, %v401_v52, -inf }
 0x36f   :  { %v2244_v53 = vpop.f32.mrf.mxu1 }
 0x370   :  { %v163_v53 = vld [vmem:[%s2830_s4] sm:$0xff] }
 0x3bc   :  { %v800_v54 = vpop.xlane.xlu1 %799 }
 0x3bd   :  { %v820_v55 = vsub.f32 %v323_v41, %v800_v54 }
 0x3bf   :  { %v829_v56 = vmul.f32 1.442695, %v820_v55 }
 0x3c1   :  { %2384 = vpow2.f32 %v829_v56 }
 0x3ce   :  { %v2385_v57 = vpop.eup %2384 }
 0x3cf   :  { %v846_v58 = vsel %vm794_vm3, %v2385_v57, 0.0 }
 0x3d0   :  { %847 = vadd.xlane.f32.xlu0 %v846_v58 }
 0x40e   :  { %v2600_v60 = vpop.f32.mrf.mxu0 }
 0x40f   :  { %560 = vrot.lane.b32.xlu0 %v2600_v60, %s2464_s2  ;;  %562 = vrot.lane.b32.xlu1 %v2600_v60, %s2462_s1  ;;  %s2416_s1 = scalar_lea.vmem %s2124_s18, 256 }
 0x410   :  { %v2606_v61 = vpop.f32.mrf.mxu0  ;;  %p2417_p0 = scmp.ne.s32.totalorder %s2124_s18, %s2416_s1  ;;  %p2422_p2 = scmp.lt.s32.totalorder %s2416_s1, %s2416_s1 }
 0x412   :  { %v479_v62 = vpop.f32.mrf.mxu0  ;;  %p2423_p3 = por %p2422_p2, %p2421_p1 }
 0x413   :  { %718 = vrot.lane.b32.xlu1 %v2600_v60, %s2467_s23  ;;  %v804_v2 = vsel %vm794_vm3, %v479_v62, -inf }
 0x414   :  { %v2249_v63 = vpop.f32.mrf.mxu0  ;;  %p2424_p4 = pnand %p2423_p3, %p2417_p0 }
 0x417   :  { %716 = vrot.lane.b32.xlu1 %v2600_v60, %s2468_s0 }
 0x41b   :  { %964 = vrot.lane.b32.xlu1 %v2598_v59, %s2464_s2 }
 0x42e   :  { %802 = vmax.xlane.f32.xlu0 %v801_v0  ;;  %v2721_v0 = vld [vmem:[%s2830_s4 + $0x28] sm:$0xff] }
 0x43f   :  { %796 = vmax.xlane.f32.xlu1 %v795_v1 }
 0x443   :  { %805 = vmax.xlane.f32.xlu1 %v804_v2 }
 0x444   :  { %484 = vrot.lane.b32.xlu0 %v2600_v60, %s2463_s3 }
 0x459   :  { %v848_v3 = vpop.xlane.xlu0 %847 }
 0x45a   :  { %2386 = vrcp.f32 %v848_v3  ;;  %v2729_v3 = vld [vmem:[%s2830_s4 + $0x20] sm:$0xff] }
 0x467   :  { %v2387_v8 = vpop.eup %2386 }
 0x468   :  { %v2630_v10 = vmul.f32 %v2387_v8, %v2385_v57 }
 0x481   :  { %v563_v4 = vpop.permute.xlu1 %562  ;;  %v561_v5 = vpop.permute.xlu0 %560 }
 0x482   :  { %2256 = vmatpush3.xpose.msk.msra.mxu0 %vm174_vm2, %v563_v4 }
 0x483   :  { %2265 = vmatprep.subr.mxu0 %v2460_v11 }
 0x485   :  { %2258 = vmatmul.mubr.msk.f32.vlgmr.msra.gmra.mxu0 %vm174_vm2, %v561_v5  ;;  %v719_v6 = vpop.permute.xlu1 %718 }
 0x486   :  { %2266 = vmatpush3.xpose.msk.msra.mxu0 %vm174_vm2, %v719_v6  ;;  %2267 = vmatprep.mubr.msk.f32.mxu0 %vm2461_vm1, %v2460_v11 }
 0x487   :  { %2275 = vmatprep.subr.mxu0 %v2460_v11 }
 0x489   :  { %v717_v7 = vpop.permute.xlu1 %716 }
 0x48a   :  { %2268 = vmatmul.mubr.msk.f32.vlgmr.msra.gmra.mxu0 %vm174_vm2, %v717_v7  ;;  %v2742_v7 = vld [vmem:[%s2830_s4 + $0x38] sm:$0xff] }
 0x48b   :  { %2277 = vmatprep.mubr.msk.f32.mxu0 %vm2461_vm1, %v2460_v11 }
 0x48d   :  { %v965_v9 = vpop.permute.xlu1 %964 }
 0x48e   :  { %2276 = vmatpush3.msra.mxu0 %v965_v9  ;;  %v2748_v9 = vld [vmem:[%s2830_s4 + $0x30] sm:$0xff] }
 0x48f   :  { %2278 = vmatmul.mubr.msk.f32.vlgmr.msra.gmra.mxu0 %vm794_vm3, %v2630_v10  ;;  %2287 = vmatprep.subr.mxu0 %v2460_v11 }
 0x490   :  { %2291 = vmatprep.mubr.msk.f32.mxu0 %vm2461_vm1, %v2460_v11 }
 0x4b7   :  { %v803_v12 = vpop.xlane.xlu0 %802 }
 0x4b8   :  { %v821_v13 = vsub.f32 %v401_v52, %v803_v12  ;;  %v164_v52 = vld [vmem:[%s2830_s4 + $0x8] sm:$0xff]  ;;  %s2469_s4 = smov 8  }
 0x4b9   :  { %2288 = vmatpush3.msra.mxu0 %v164_v52 }
 0x4ba   :  { %v831_v14 = vmul.f32 1.442695, %v821_v13  ;;  %2289 = vmatprep.subr.mxu0 %v2460_v11 }
 0x4bb   :  { %v485_v15 = vpop.permute.xlu0 %484  ;;  %2290 = vmatpush3.msra.mxu0 %v163_v53 }
 0x4bc   :  { %2388 = vpow2.f32 %v831_v14  ;;  %2251 = vmatpush3.xpose.msk.msra.mxu1 %vm174_vm2, %v485_v15  ;;  %2299 = vmatprep.subr.mxu0 %v2460_v11 }
 0x4bd   :  { %2260 = vmatprep.subr.mxu1 %v2460_v11 }
 0x4bf   :  { %2253 = vmatmul.mubr.msk.f32.vlgmr.msra.gmra.mxu1 %vm174_vm2, %v2600_v60 }
 0x4c0   :  { %2262 = vmatprep.mubr.msk.f32.mxu1 %vm2461_vm1, %v2460_v11 }
 0x4c8   :  { %v797_v16 = vpop.xlane.xlu1 %796 }
 0x4c9   :  { %v2389_v17 = vpop.eup %2388  ;;  %v819_v18 = vsub.f32 %v2586_v39, %v797_v16 }
 0x4ca   :  { %v849_v19 = vsel %vm794_vm3, %v2389_v17, 0.0 }
 0x4cb   :  { %v827_v20 = vmul.f32 1.442695, %v819_v18  ;;  %850 = vadd.xlane.f32.xlu0 %v849_v19 }
 0x4cc   :  { %v806_v21 = vpop.xlane.xlu1 %805 }
 0x4cd   :  { %2390 = vpow2.f32 %v827_v20  ;;  %v822_v22 = vsub.f32 %v479_v62, %v806_v21 }
 0x4cf   :  { %v833_v23 = vmul.f32 1.442695, %v822_v22 }
 0x4d1   :  { %2392 = vpow2.f32 %v833_v23 }
 0x4da   :  { %v2391_v24 = vpop.eup %2390 }
 0x4db   :  { %v843_v25 = vsel %vm794_vm3, %v2391_v24, 0.0 }
 0x4dc   :  { %844 = vadd.xlane.f32.xlu1 %v843_v25 }
 0x4de   :  { %v2393_v26 = vpop.eup %2392 }
 0x4df   :  { %v852_v27 = vsel %vm794_vm3, %v2393_v26, 0.0 }
 0x4e0   :  { %853 = vadd.xlane.f32.xlu1 %v852_v27 }
 0x4e1   :  { %1191 = vrot.lane.b32.xlu0 %v2598_v59, %s2466_s22 }
 0x4f1   :  { %640 = vrot.lane.b32.xlu1 %v2600_v60, %s2465_s21 }
 0x4f5   :  { %638 = vrot.lane.b32.xlu1 %v2600_v60, %s2466_s22 }
 0x4f9   :  { %1346 = vrot.lane.b32.xlu1 %v2598_v59, %s2468_s0 }
 0x545   :  { %v634_v28 = vpop.f32.mrf.mxu0 }
 0x546   :  { %v810_v29 = vsel %vm794_vm3, %v634_v28, -inf }
 0x547   :  { %811 = vmax.xlane.f32.xlu0 %v810_v29  ;;  %v2259_v30 = vpop.f32.mrf.mxu0 }
 0x54a   :  { %v2656_v31 = vpop.f32.mrf.mxu0 }
 0x54b   :  { %v816_v2 = vsel %vm794_vm3, %v2656_v31, -inf }
 0x54c   :  { %v2269_v32 = vpop.f32.mrf.mxu0 }
 0x54f   :  { %v1035_v33 = vpop.f32.mrf.mxu0 }
 0x551   :  { %v2279_v34 = vpop.f32.mrf.mxu0 }
 0x554   :  { %v851_v36 = vpop.xlane.xlu0 %850 }
 0x558   :  { %v1192_v45 = vpop.permute.xlu0 %1191 }
 0x55d   :  { %1576 = vrot.lane.b32.xlu0 %v2606_v61, %s2464_s2 }
 0x565   :  { %v845_v35 = vpop.xlane.xlu1 %844 }
 0x566   :  { %2394 = vrcp.f32 %v845_v35 }
 0x567   :  { %2396 = vrcp.f32 %v851_v36 }
 0x569   :  { %v854_v37 = vpop.xlane.xlu1 %853 }
 0x56a   :  { %2398 = vrcp.f32 %v854_v37 }
 0x56d   :  { %v641_v38 = vpop.permute.xlu1 %640 }
 0x56e   :  { %2261 = vmatpush3.xpose.msk.msra.mxu1 %vm174_vm2, %v641_v38 }
 0x56f   :  { %2270 = vmatprep.subr.mxu1 %v2460_v11 }
 0x571   :  { %v639_v39 = vpop.permute.xlu1 %638 }
 0x572   :  { %2263 = vmatmul.mubr.msk.f32.vlgmr.msra.gmra.mxu1 %vm174_vm2, %v639_v39 }
 0x573   :  { %v2395_v40 = vpop.eup %2394  ;;  %2271 = vmatpush3.msra.mxu1 %v2598_v59  ;;  %2272 = vmatprep.mubr.msk.f32.mxu1 %vm2461_vm1, %v2460_v11 }
 0x574   :  { %2280 = vmatprep.subr.mxu1 %v2460_v11  ;;  %v875_v41 = vmul.f32 %v2395_v40, %v2391_v24  ;;  %v2397_v44 = vpop.eup %2396 }
 0x575   :  { %v2689_v46 = vmul.f32 %v2397_v44, %v2389_v17  ;;  %v1347_v48 = vpop.permute.xlu1 %1346 }
 0x576   :  { %2273 = vmatmul.mubr.msk.f32.vlgmr.msra.gmra.mxu1 %vm794_vm3, %v875_v41  ;;  %883 = vst.msk [vmem:[#allocation4] sm:$0xff] %vm794_vm3, %v875_v41 }
 0x577   :  { %2281 = vmatpush3.msra.mxu1 %v2670_v42  ;;  %2284 = vmatprep.mubr.msk.f32.mxu1 %vm2461_vm1, %v2460_v11  ;;  %v2399_v47 = vpop.eup %2398 }
 0x578   :  { %2282 = vmatprep.subr.mxu1 %v2460_v11  ;;  %v2698_v50 = vmul.f32 %v2399_v47, %v2393_v26 }
 0x579   :  { %2283 = vmatpush3.msra.mxu1 %v2677_v43 }
 0x57a   :  { %2294 = vmatprep.subr.mxu1 %v2460_v11  ;;  %2285 = vmatmul.mubr.msk.f32.vlgmr.msra.gmra.mxu1 %vm174_vm2, %v1035_v33 }
 0x57b   :  { %2295 = vmatpush3.msra.mxu1 %v1192_v45  ;;  %2296 = vmatprep.mubr.msk.f32.mxu1 %vm2461_vm1, %v2460_v11 }
 0x57c   :  { %2306 = vmatprep.subr.mxu1 %v2460_v11 }
 0x57e   :  { %2297 = vmatmul.mubr.msk.f32.vlgmr.msra.gmra.mxu1 %vm794_vm3, %v2689_v46 }
 0x57f   :  { %2307 = vmatpush3.msra.mxu1 %v1347_v48  ;;  %v2693_v49 = vpop.f32.mrf.mxu1  ;;  %2308 = vmatprep.mubr.msk.f32.mxu1 %vm2461_vm1, %v2460_v11 }
 0x580   :  { %2318 = vmatprep.subr.mxu1 %v2460_v11  ;;  %v807_v59 = vsel %vm794_vm3, %v2693_v49, -inf }
 0x581   :  { %v2254_v51 = vpop.f32.mrf.mxu1 }
 0x582   :  { %2309 = vmatmul.mubr.msk.f32.vlgmr.msra.gmra.mxu1 %vm794_vm3, %v2698_v50 }
 0x583   :  { %2319 = vmatpush3.msra.mxu1 %v2606_v61  ;;  %2320 = vmatprep.mubr.msk.f32.mxu1 %vm2461_vm1, %v2460_v11 }
 0x584   :  { %2328 = vmatprep.subr.mxu1 %v2460_v11 }
 0x5d0   :  { %v812_v54 = vpop.xlane.xlu0 %811 }
 0x5d1   :  { %v824_v55 = vsub.f32 %v634_v28, %v812_v54 }
 0x5d3   :  { %v837_v56 = vmul.f32 1.442695, %v824_v55 }
 0x5d4   :  { %v1577_v14 = vpop.permute.xlu0 %1576 }
 0x5d5   :  { %2400 = vpow2.f32 %v837_v56 }
 0x5e2   :  { %v2401_v57 = vpop.eup %2400 }
 0x5e3   :  { %v858_v58 = vsel %vm794_vm3, %v2401_v57, 0.0 }
 0x5e4   :  { %859 = vadd.xlane.f32.xlu1 %v858_v58 }
 0x5e8   :  { %808 = vmax.xlane.f32.xlu1 %v807_v59 }
 0x632   :  { %v712_v60 = vpop.f32.mrf.mxu1 }
 0x633   :  { %v813_v62 = vsel %vm794_vm3, %v712_v60, -inf }
 0x634   :  { %v2264_v63 = vpop.f32.mrf.mxu1  ;;  %814 = vmax.xlane.f32.xlu1 %v813_v62 }
 0x636   :  { %v953_v1 = vpop.f32.mrf.mxu1 }
 0x637   :  { %2292 = vmatmul.mubr.msk.f32.vlgmr.msra.gmra.mxu0 %vm174_vm2, %v953_v1 }
 0x638   :  { %v2274_v4 = vpop.f32.mrf.mxu1  ;;  %817 = vmax.xlane.f32.xlu1 %v816_v2  ;;  %2300 = vmatpush3.msra.mxu0 %v2721_v0 }
 0x639   :  { %2301 = vmatprep.subr.mxu0 %v2460_v11  ;;  %2303 = vmatprep.mubr.msk.f32.mxu0 %vm2461_vm1, %v2460_v11 }
 0x63a   :  { %v2735_v5 = vpop.f32.mrf.mxu1  ;;  %2302 = vmatpush3.msra.mxu0 %v2729_v3 }
 0x63b   :  { %2311 = vmatprep.subr.mxu0 %v2460_v11 }
 0x63c   :  { %v2286_v6 = vpop.f32.mrf.mxu1 }
 0x63e   :  { %v1262_v8 = vpop.f32.mrf.mxu1 }
 0x63f   :  { %2304 = vmatmul.mubr.msk.f32.vlgmr.msra.gmra.mxu0 %vm174_vm2, %v1262_v8 }
 0x640   :  { %2312 = vmatpush3.msra.mxu0 %v2742_v7  ;;  %v2298_v12 = vpop.f32.mrf.mxu1  ;;  %2315 = vmatprep.mubr.msk.f32.mxu0 %vm2461_vm1, %v2460_v11 }
 0x641   :  { %2313 = vmatprep.subr.mxu0 %v2460_v11 }
 0x642   :  { %2314 = vmatpush3.msra.mxu0 %v2748_v9  ;;  %v1417_v13 = vpop.f32.mrf.mxu1 }
 0x643   :  { %2323 = vmatprep.subr.mxu0 %v2460_v11  ;;  %2316 = vmatmul.mubr.msk.f32.vlgmr.msra.gmra.mxu0 %vm174_vm2, %v1417_v13 }
 0x644   :  { %2324 = vmatpush3.msra.mxu0 %v1577_v14  ;;  %v2310_v15 = vpop.f32.mrf.mxu1  ;;  %2325 = vmatprep.mubr.msk.f32.mxu0 %vm2461_vm1, %v2460_v11 }
 0x645   :  { %2335 = vmatprep.subr.mxu0 %v2460_v11 }
 0x66d   :  { %v860_v16 = vpop.xlane.xlu1 %859 }
 0x66e   :  { %2402 = vrcp.f32 %v860_v16 }
 0x671   :  { %v809_v17 = vpop.xlane.xlu1 %808 }
 0x672   :  { %v823_v18 = vsub.f32 %v2693_v49, %v809_v17 }
 0x674   :  { %v835_v19 = vmul.f32 1.442695, %v823_v18 }
 0x676   :  { %2404 = vpow2.f32 %v835_v19 }
 0x67b   :  { %v2403_v20 = vpop.eup %2402 }
 0x67c   :  { %v880_v21 = vmul.f32 %v2403_v20, %v2401_v57 }
 0x67e   :  { %2326 = vmatmul.mubr.msk.f32.vlgmr.msra.gmra.mxu0 %vm794_vm3, %v880_v21 }
 0x67f   :  { %2336 = vmatpush3.msra.mxu0 %v164_v52  ;;  %2339 = vmatprep.mubr.msk.f32.mxu0 %vm2461_vm1, %v2460_v11 }
 0x680   :  { %2337 = vmatprep.subr.mxu0 %v2460_v11 }
 0x681   :  { %2338 = vmatpush3.msra.mxu0 %v163_v53 }
 0x682   :  { %2347 = vmatprep.subr.mxu0 %v2460_v11 }
 0x683   :  { %v2405_v22 = vpop.eup %2404 }
 0x684   :  { %v855_v23 = vsel %vm794_vm3, %v2405_v22, 0.0 }
 0x685   :  { %856 = vadd.xlane.f32.xlu1 %v855_v23 }
 0x6bd   :  { %v815_v24 = vpop.xlane.xlu1 %814 }
 0x6be   :  { %v825_v25 = vsub.f32 %v712_v60, %v815_v24 }
 0x6c0   :  { %v839_v26 = vmul.f32 1.442695, %v825_v25 }
 0x6c1   :  { %v818_v27 = vpop.xlane.xlu1 %817 }
 0x6c2   :  { %2406 = vpow2.f32 %v839_v26  ;;  %v826_v28 = vsub.f32 %v2656_v31, %v818_v27 }
 0x6c4   :  { %v841_v29 = vmul.f32 1.442695, %v826_v28 }
 0x6c6   :  { %2408 = vpow2.f32 %v841_v29 }
 0x6cf   :  { %v2407_v30 = vpop.eup %2406 }
 0x6d0   :  { %v861_v32 = vsel %vm794_vm3, %v2407_v30, 0.0 }
 0x6d1   :  { %862 = vadd.xlane.f32.xlu0 %v861_v32 }
 0x6d3   :  { %v2409_v33 = vpop.eup %2408 }
 0x6d4   :  { %v864_v34 = vsel %vm794_vm3, %v2409_v33, 0.0 }
 0x6d5   :  { %865 = vadd.xlane.f32.xlu1 %v864_v34 }
 0x6e6   :  { %1802 = vrot.lane.b32.xlu1 %v2606_v61, %s2466_s22 }
 0x6e7   :  { %1186 = vrot.lane.b32.xlu0 %v2689_v46, %s2467_s23 }
 0x6ea   :  { %1956 = vrot.lane.b32.xlu1 %v2606_v61, %s2468_s0 }
 0x6ee   :  { %958 = vrot.lane.b32.xlu1 %v2630_v10, %s2469_s4 }
 0x6f2   :  { %1571 = vrot.lane.b32.xlu1 %v880_v21, %s2469_s4 }
 0x6f6   :  { %1341 = vrot.lane.b32.xlu1 %v2698_v50, %s2470_s16 }
 0x6f7   :  { %v1181_v31 = vpop.f32.mrf.mxu0 }
 0x6f8   :  { %v1182_v37 = vadd.f32 %v1181_v31, %v2735_v5 }
 0x6f9   :  { %v2293_v35 = vpop.f32.mrf.mxu0 }
 0x6ff   :  { %v1335_v36 = vpop.f32.mrf.mxu0 }
 0x700   :  { %v1339_v39 = vadd.f32 %v1335_v36, %v1182_v37 }
 0x701   :  { %v2305_v38 = vpop.f32.mrf.mxu0 }
 0x703   :  { %v1490_v40 = vpop.f32.mrf.mxu0 }
 0x704   :  { %v1494_v41 = vadd.f32 %v1490_v40, %v1339_v39 }
 0x705   :  { %v2317_v61 = vpop.f32.mrf.mxu0 }
 0x706   :  { %1495 = vst.msk [vmem:[#allocation2] sm:$0xff] %vm26_vm0, %v1494_v41 }
 0x70e   :  { %v857_v44 = vpop.xlane.xlu1 %856 }
 0x70f   :  { %2410 = vrcp.f32 %v857_v44 }
 0x71c   :  { %v2411_v10 = vpop.eup %2410 }
 0x71d   :  { %v879_v45 = vmul.f32 %v2411_v10, %v2405_v22 }
 0x71f   :  { %2321 = vmatmul.mubr.msk.f32.vlgmr.msra.gmra.mxu1 %vm794_vm3, %v879_v45  ;;  %1496 = vst.msk [vmem:[#allocation4 + $0x8] sm:$0xff] %vm794_vm3, %v879_v45 }
 0x720   :  { %2329 = vmatpush3.msra.mxu1 %v2670_v42  ;;  %2332 = vmatprep.mubr.msk.f32.mxu1 %vm2461_vm1, %v2460_v11 }
 0x721   :  { %2330 = vmatprep.subr.mxu1 %v2460_v11 }
 0x722   :  { %2331 = vmatpush3.msra.mxu1 %v2677_v43 }
 0x723   :  { %2342 = vmatprep.subr.mxu1 %v2460_v11 }
 0x73e   :  { %v1647_v46 = vpop.f32.mrf.mxu0 }
 0x73f   :  { %2333 = vmatmul.mubr.msk.f32.vlgmr.msra.gmra.mxu1 %vm174_vm2, %v1647_v46 }
 0x740   :  { %v2327_v47 = vpop.f32.mrf.mxu0  ;;  %2344 = vmatprep.mubr.msk.f32.mxu1 %vm2461_vm1, %v2460_v11 }
 0x75a   :  { %v863_v48 = vpop.xlane.xlu0 %862 }
 0x75b   :  { %2412 = vrcp.f32 %v863_v48 }
 0x75e   :  { %v866_v49 = vpop.xlane.xlu1 %865  ;;  %v1187_v53 = vpop.permute.xlu0 %1186 }
 0x75f   :  { %2414 = vrcp.f32 %v866_v49 }
 0x762   :  { %v1803_v42 = vpop.permute.xlu1 %1802 }
 0x763   :  { %2343 = vmatpush3.msra.mxu1 %v1803_v42 }
 0x764   :  { %2354 = vmatprep.subr.mxu1 %v2460_v11 }
 0x766   :  { %v1957_v50 = vpop.permute.xlu1 %1956 }
 0x768   :  { %v2413_v51 = vpop.eup %2412 }
 0x769   :  { %v881_v43 = vmul.f32 %v2413_v51, %v2407_v30 }
 0x76a   :  { %v959_v52 = vpop.permute.xlu1 %958 }
 0x76b   :  { %962 = vst.msk [vmem:[#allocation4] sm:$0xff] %vm961_vm4, %v959_v52  ;;  %1798 = vrot.lane.b32.xlu1 %v881_v43, %s2467_s23  ;;  %2345 = vmatmul.mubr.msk.f32.vlgmr.msra.gmra.mxu1 %vm794_vm3, %v881_v43 }
 0x76c   :  { %v2415_v54 = vpop.eup %2414  ;;  %2355 = vmatpush3.msra.mxu1 %v1957_v50  ;;  %2356 = vmatprep.mubr.msk.f32.mxu1 %vm2461_vm1, %v2460_v11  ;;  %1190 = vst.msk [vmem:[#allocation4] sm:$0xff] %vm1189_vm5, %v1187_v53 }
 0x76d   :  { %v882_v55 = vmul.f32 %v2415_v54, %v2409_v33 }
 0x76e   :  { %v1572_v56 = vpop.permute.xlu1 %1571 }
 0x76f   :  { %1574 = vst.msk [vmem:[#allocation4 + $0x8] sm:$0xff] %vm961_vm4, %v1572_v56  ;;  %1952 = vrot.lane.b32.xlu1 %v882_v55, %s2470_s16  ;;  %2357 = vmatmul.mubr.msk.f32.vlgmr.msra.gmra.mxu1 %vm794_vm3, %v882_v55 }
 0x772   :  { %v1342_v57 = vpop.permute.xlu1 %1341 }
 0x773   :  { %1345 = vst.msk [vmem:[#allocation4] sm:$0xff] %vm1344_vm6, %v1342_v57 }
 0x7dd   :  { %v1799_v58 = vpop.permute.xlu1 %1798 }
 0x7de   :  { %1801 = vst.msk [vmem:[#allocation4 + $0x8] sm:$0xff] %vm1189_vm5, %v1799_v58 }
 0x7df   :  { %v1566_v59 = vpop.f32.mrf.mxu1 }
 0x7e0   :  { %2340 = vmatmul.mubr.msk.f32.vlgmr.msra.gmra.mxu0 %vm174_vm2, %v1566_v59 }
 0x7e1   :  { %v1953_v60 = vpop.permute.xlu1 %1952  ;;  %v2322_v62 = vpop.f32.mrf.mxu1  ;;  %2348 = vmatpush3.msra.mxu0 %v2721_v0  ;;  %2351 = vmatprep.mubr.msk.f32.mxu0 %vm2461_vm1, %v2460_v11 }
 0x7e2   :  { %1955 = vst.msk [vmem:[#allocation4 + $0x8] sm:$0xff] %vm1344_vm6, %v1953_v60  ;;  %2349 = vmatprep.subr.mxu0 %v2460_v11 }
 0x7e3   :  { %2350 = vmatpush3.msra.mxu0 %v2729_v3 }
 0x7e4   :  { %2359 = vmatprep.subr.mxu0 %v2460_v11 }
 0x7ff   :  { %v1720_v63 = vpop.f32.mrf.mxu1 }
 0x801   :  { %v2334_v1 = vpop.f32.mrf.mxu1 }
 0x82b   :  { %v1873_v2 = vpop.f32.mrf.mxu1 }
 0x82c   :  { %2352 = vmatmul.mubr.msk.f32.vlgmr.msra.gmra.mxu0 %vm174_vm2, %v1873_v2 }
 0x82d   :  { %2360 = vmatpush3.msra.mxu0 %v2742_v7  ;;  %v2346_v4 = vpop.f32.mrf.mxu1  ;;  %2363 = vmatprep.mubr.msk.f32.mxu0 %vm2461_vm1, %v2460_v11 }
 0x82e   :  { %2361 = vmatprep.subr.mxu0 %v2460_v11 }
 0x82f   :  { %2362 = vmatpush3.msra.mxu0 %v2748_v9  ;;  %v2027_v0 = vpop.f32.mrf.mxu1 }
 0x830   :  { %2364 = vmatmul.mubr.msk.f32.vlgmr.msra.gmra.mxu0 %vm174_vm2, %v2027_v0 }
 0x831   :  { %v2358_v3 = vpop.f32.mrf.mxu1 }
 0x832   :  { %2427 = shalt.err (!%p2424_p4)
}
 0x833   :  { %s2472_s3 = smov 128   ;;  %s2473_s20 = smov [#allocation2]  }
 0x834   :  { %2129 = dma.vmem_to_hbm [thread:$0]  %s2124_s18, 256, %s2832_s6, [#allocation5], %s2472_s3, %s2472_s3, %s2469_s4  }
 0x835   :  { %s2111_s21 = sshll.u32 %s2473_s20, 4  ;;  %s2112_s21 = int_to_ptr.vmem [resolvable:$true] %s2111_s21 }
 0x836   :  { %s2436_s22 = scalar_lea.vmem %s2112_s21, 256  ;;  %p2441_p6 = scmp.lt.s32.totalorder %s2112_s21, %s2112_s21 }
 0x837   :  { %p2437_p5 = scmp.ne.s32.totalorder %s2112_s21, %s2436_s22  ;;  %p2442_p7 = scmp.lt.s32.totalorder %s2436_s22, %s2436_s22 }
 0x839   :  { %p2443_p8 = por %p2442_p7, %p2441_p6 }
 0x83b   :  { %p2444_p9 = pnand %p2443_p8, %p2437_p5 }
 0x8a0   :  { %v1793_v11 = vpop.f32.mrf.mxu0 }
 0x8a1   :  { %v1794_v7 = vadd.f32 %v1793_v11, %v1720_v63 }
 0x8a2   :  { %v2341_v5 = vpop.f32.mrf.mxu0 }
 0x8ec   :  { %v1946_v6 = vpop.f32.mrf.mxu0 }
 0x8ed   :  { %v1950_v9 = vadd.f32 %v1946_v6, %v1794_v7 }
 0x8ee   :  { %v2353_v8 = vpop.f32.mrf.mxu0 }
 0x8f0   :  { %v2100_v12 = vpop.f32.mrf.mxu0 }
 0x8f1   :  { %v2104_v13 = vadd.f32 %v2100_v12, %v1950_v9 }
 0x8f2   :  { %v2365_v14 = vpop.f32.mrf.mxu0 }
 0x8f3   :  { %2105 = vst.msk [vmem:[#allocation2 + $0x8] sm:$0xff] %vm26_vm0, %v2104_v13 }
 0x8f4   :  { %2447 = shalt.err (!%p2444_p9)
}
 0x8f5   :  { %2117 = dma.vmem_to_hbm [thread:$0]  %s2112_s21, 256, %s2831_s5, [#allocation3], %s2472_s3, %s2472_s3, %s2469_s4  }
 0x8f6   :  { %2456 = dma.done.wait [#allocation3], 256  }
 0x8f7   :  { %2457 = vsyncadd [#allocation3], 4294967040 }
 0x8f8   :  { %2458 = dma.done.wait [#allocation5], 256  }
 0x8f9   :  { %2459 = vsyncadd [#allocation5], 4294967040 }
 0x8fa   :  { %2136 = vsyncpa [#allocation3], 1 }
 0x8fb   :  { %2137 = vsyncpa [#allocation5], 1 }

</bundles_post_ra>
